<compile_context>
chip_gen: v6e
topology: v6e:2x2x1
jax: 0.10.0
libtpu: 0.0.40
codegen_flags: <defaults>
</compile_context>

<pallas_src>
import functools

import jax
import jax.numpy as jnp
import numpy as np
from jax.experimental import pallas as pl
from jax.experimental.pallas import tpu as pltpu

C1 = 32     # conv1 out channels
C2 = 64     # conv2 out channels
K = 3       # kernel size
LANE = 128  # TPU lane width / padded channel axis


def cnn_survival_kernel(x5_ref, w1_ref, w2_ref, mask_ref, pooled_ref, *, inv_l):
    """One batch tile.

    x5_ref     : (TB*L8, 8)   5 x-taps + ones column (+2 zero cols)
    w1_ref     : (8, 128)     block-banded conv1 weights + bias row + ones-lane
    w2_ref     : (128, 128)   conv2 weights (rows 0:96) + bias row 96; zero pad
    mask_ref   : (L8, 128)    conv-padding / valid-length mask for the slab
    pooled_ref : (TB, 128)    global-average-pooled features (cols 64: are 0)
    """
    tb = pooled_ref.shape[0]
    l8 = mask_ref.shape[0]

    # conv1 + bias + ReLU, emitted directly as the 128-lane conv2 im2col slab:
    # lanes [0:32)=h1[l-1], [32:64)=h1[l], [64:96)=h1[l+1], lane 96 = 1 (bias).
    a = jnp.dot(x5_ref[...], w1_ref[...], preferred_element_type=jnp.float32)
    a = jnp.maximum(a, 0.0)                                       # (TB*L8, 128)

    # One multiplicative mask handles conv2's zero padding at l==0 / l==L-1 and
    # zeroes the L..L8 padding rows entirely (incl. the bias lane), so padded
    # rows contribute exactly zero downstream.
    a = a.reshape(tb, l8, LANE) * mask_ref[...][None, :, :]

    # conv2 + bias (lane 96) + ReLU: one MXU matmul with K=128, N=128.
    h2 = jnp.dot(a.reshape(tb * l8, LANE), w2_ref[...],
                 preferred_element_type=jnp.float32)              # (TB*L8, 128)
    h2 = jnp.maximum(h2, 0.0)

    # Global average pool over the sequence; padded rows are exactly zero.
    pooled_ref[...] = jnp.sum(h2.reshape(tb, l8, LANE), axis=1) * inv_l


def _pick_tile_and_vmem(B, L8):
    """Chip-aware batch tile + scoped-VMEM request (lane-padded footprints)."""
    try:
        kind = jax.devices()[0].device_kind.lower()
    except Exception:
        kind = ""
    is_v7 = "v7" in kind
    # v7x: 64 MiB physical / 32 MiB scoped default -> keep headroom.
    # v5e/v6e: 128 MiB physical -> can go above the 32 MiB scoped default.
    vmem_limit = (26 if is_v7 else 64) * 1024 * 1024

    # Per-batch-row, per-step footprint at the *lane-padded* (128-wide f32)
    # widths the arrays actually occupy in VMEM.
    lane_bytes = LANE * 4
    per_row = L8 * lane_bytes * (
        2      # x5 input block (lane-padded), double-buffered
        + 2    # conv1 / im2col slab + masked copy
        + 1    # conv2 slab
    )
    per_row = int(per_row * 1.5) + 4 * lane_bytes    # transients + out block

    budget = int(vmem_limit * 0.6)
    tb = max(8, (budget // per_row) // 8 * 8)

    # Keep >= 2 grid steps when the batch allows it, so both v7x TensorCores
    # get work under dimension_semantics=("parallel",).
    if B > 8:
        half_b = ((B + 1) // 2 + 7) // 8 * 8
        tb = min(tb, max(8, half_b))

    tb = min(tb, 1024)
    b_ceil = ((B + 7) // 8) * 8
    tb = min(tb, b_ceil)
    return int(tb), vmem_limit


def cnn_survival_forward(x, w1_torch, b1, w2_torch, b2, wfc_torch, bfc):
    """x: (B, L) f32. Torch-layout weights:
       w1_torch (C1,1,K), w2_torch (C2,C1,K), wfc_torch (1,C2), bfc (1,)."""
    B, L = x.shape
    L8 = ((L + 7) // 8) * 8                       # sublane-aligned sequence length
    TB, vmem_limit = _pick_tile_and_vmem(B, L8)
    B_pad = ((B + TB - 1) // TB) * TB

    x32 = x.astype(jnp.float32)

    # ---- layout plumbing (wrapper side): 5-tap im2col of x + ones column.
    # x5[b, l, t] = x[b, l + t - 2] (zeros outside [0, L)); column 5 == 1.0
    xp = jnp.pad(x32, ((0, B_pad - B), (2, 2 + (L8 - L))))            # (B_pad, L8+4)
    taps = jnp.stack([xp[:, t:t + L8] for t in range(5)], axis=-1)    # (B_pad, L8, 5)
    x5 = jnp.concatenate(
        [taps,
         jnp.ones((B_pad, L8, 1), jnp.float32),
         jnp.zeros((B_pad, L8, 2), jnp.float32)], axis=-1)            # (B_pad, L8, 8)
    x5 = x5.reshape(B_pad * L8, 8)

    # ---- conv1 as a block-banded (8, 128) matrix producing the im2col slab:
    # W1[t, 32*j + c] = w1[t - j, c]; row 5 carries the conv1 bias and a 1.0
    # in lane 96 (the conv2-bias lane). Lanes 97..127 stay zero.
    w1_kc = jnp.transpose(w1_torch[:, 0, :], (1, 0)).astype(jnp.float32)   # (K, C1)
    w1cat = jnp.zeros((8, LANE), jnp.float32)
    for j in range(K):
        for k in range(K):
            w1cat = w1cat.at[j + k, C1 * j:C1 * (j + 1)].set(w1_kc[k])
    w1cat = w1cat.at[5, 0:K * C1].set(jnp.tile(b1.astype(jnp.float32), K))
    w1cat = w1cat.at[5, K * C1].set(1.0)

    # ---- conv2 weights padded to a clean 128x128 MXU tile:
    # rows 0..95 = repacked torch weights, row 96 = conv2 bias, rest zero;
    # columns 64..127 zero so every downstream store is lane-dense.
    w2t = (jnp.transpose(w2_torch, (2, 1, 0))
           .reshape(K * C1, C2).astype(jnp.float32))                       # (96, 64)
    w2cat = jnp.zeros((LANE, LANE), jnp.float32)
    w2cat = w2cat.at[0:K * C1, 0:C2].set(w2t)
    w2cat = w2cat.at[K * C1, 0:C2].set(b2.astype(jnp.float32))

    # ---- conv-padding / valid-length mask for the im2col slab (built once).
    l_idx = jnp.arange(L8)[:, None]
    lane = jnp.arange(LANE)[None, :]
    kill = ((l_idx >= L)
            | ((lane < C1) & (l_idx == 0))
            | ((lane >= 2 * C1) & (lane < 3 * C1) & (l_idx == L - 1)))
    mask = jnp.where(kill, 0.0, 1.0).astype(jnp.float32)                   # (L8, 128)

    pooled = pl.pallas_call(
        functools.partial(cnn_survival_kernel, inv_l=1.0 / L),
        out_shape=jax.ShapeDtypeStruct((B_pad, LANE), jnp.float32),
        grid=(B_pad // TB,),
        in_specs=[
            pl.BlockSpec((TB * L8, 8), lambda i: (i, 0)),     # batch tile of taps
            pl.BlockSpec((8, LANE), lambda i: (0, 0)),        # weights: replicated
            pl.BlockSpec((LANE, LANE), lambda i: (0, 0)),
            pl.BlockSpec((L8, LANE), lambda i: (0, 0)),
        ],
        out_specs=pl.BlockSpec((TB, LANE), lambda i: (i, 0)),  # lane-dense output
        compiler_params=pltpu.CompilerParams(
            dimension_semantics=("parallel",),
            vmem_limit_bytes=vmem_limit),
    )(x5, w1cat, w2cat, mask)

    # final Linear(64 -> 1) + bias on the lane-dense pooled features.
    risk = (pooled[:B, :C2] @ jnp.transpose(wfc_torch).astype(jnp.float32)
            + bfc.astype(jnp.float32))
    return risk[:, 0]                                                      # (B,)


def reference_forward(x, w1_torch, b1, w2_torch, b2, wfc_torch, bfc):
    """Pure-JAX NCL reference matching the PyTorch module exactly."""
    xi = x[:, None, :]                                                     # (B,1,L)
    y = jax.lax.conv_general_dilated(xi, w1_torch, (1,), [(1, 1)],
                                     dimension_numbers=('NCH', 'OIH', 'NCH'))
    y = jax.nn.relu(y + b1[None, :, None])
    y = jax.lax.conv_general_dilated(y, w2_torch, (1,), [(1, 1)],
                                     dimension_numbers=('NCH', 'OIH', 'NCH'))
    y = jax.nn.relu(y + b2[None, :, None])
    pooled = jnp.mean(y, axis=-1)                                          # (B,C2)
    return (pooled @ wfc_torch.T + bfc).squeeze(-1)


if __name__ == "__main__":
    B, L = 2, 16   # batch=2, input_dim=16

    key = jax.random.PRNGKey(0)
    ks = jax.random.split(key, 7)

    # deterministic param init (torch-like uniform(+-1/sqrt(fan_in)))
    s1 = 1.0 / np.sqrt(1 * K)
    w1_torch = jax.random.uniform(ks[0], (C1, 1, K), jnp.float32, -s1, s1)
    b1 = jax.random.uniform(ks[1], (C1,), jnp.float32, -s1, s1)

    s2 = 1.0 / np.sqrt(C1 * K)
    w2_torch = jax.random.uniform(ks[2], (C2, C1, K), jnp.float32, -s2, s2)
    b2 = jax.random.uniform(ks[3], (C2,), jnp.float32, -s2, s2)

    s3 = 1.0 / np.sqrt(C2)
    wfc_torch = jax.random.uniform(ks[4], (1, C2), jnp.float32, -s3, s3)
    bfc = jax.random.uniform(ks[5], (1,), jnp.float32, -s3, s3)

    x = jax.random.normal(ks[6], (B, L), jnp.float32)

    risk = cnn_survival_forward(x, w1_torch, b1, w2_torch, b2, wfc_torch, bfc)
    risk = jax.block_until_ready(risk)

    ref = reference_forward(x, w1_torch, b1, w2_torch, b2, wfc_torch, bfc)
    ref = jax.block_until_ready(ref)

    assert risk.shape == (B,), risk.shape
    np.testing.assert_allclose(np.asarray(risk), np.asarray(ref),
                               rtol=1e-4, atol=1e-5)
    print("KERNEL_OK")
</pallas_src>

<mosaic_0001>
module attributes {stable_mosaic.version = 11 : i64} {
  func.func @cnn_survival_kernel(%arg0: i32, %arg1: memref<128x8xf32, #tpu.memory_space<vmem>>, %arg2: memref<8x128xf32, #tpu.memory_space<vmem>>, %arg3: memref<128x128xf32, #tpu.memory_space<vmem>>, %arg4: memref<16x128xf32, #tpu.memory_space<vmem>>, %arg5: memref<8x128xf32, #tpu.memory_space<vmem>>) attributes {dimension_semantics = [#tpu.dimension_semantics<parallel>], iteration_bounds = array<i64: 1>, scalar_prefetch = 0 : i64, scratch_operands = 0 : i64, tpu.core_type = #tpu.core_type<tc>, window_params = [{transform_indices = @transform_0, window_bounds = array<i64: 128, 8>}, {pipeline_mode = #tpu.pipeline_mode<synchronous>, transform_indices = @transform_1, window_bounds = array<i64: 8, 128>}, {pipeline_mode = #tpu.pipeline_mode<synchronous>, transform_indices = @transform_2, window_bounds = array<i64: 128, 128>}, {pipeline_mode = #tpu.pipeline_mode<synchronous>, transform_indices = @transform_3, window_bounds = array<i64: 16, 128>}, {transform_indices = @transform_4, window_bounds = array<i64: 8, 128>}]} {
    %c0 = arith.constant 0 : index
    %c0_0 = arith.constant 0 : index
    %0 = vector.load %arg1[%c0, %c0_0] : memref<128x8xf32, #tpu.memory_space<vmem>>, vector<128x8xf32>
    %c0_1 = arith.constant 0 : index
    %c0_2 = arith.constant 0 : index
    %1 = vector.load %arg2[%c0_1, %c0_2] : memref<8x128xf32, #tpu.memory_space<vmem>>, vector<8x128xf32>
    %cst = arith.constant dense<0.000000e+00> : vector<128x128xf32>
    %2 = tpu.matmul %0, %1, %cst {dimension_numbers = #tpu.dot_dimension_numbers<[1], [0], [0], [1], [0, 0, 1, 1], [], []>} : vector<128x8xf32>, vector<8x128xf32>, vector<128x128xf32> -> vector<128x128xf32>
    %cst_3 = arith.constant 0.000000e+00 : f32
    %3 = vector.broadcast %cst_3 : f32 to vector<128x128xf32>
    %4 = arith.maximumf %2, %3 : vector<128x128xf32>
    %5 = vector.shape_cast %4 : vector<128x128xf32> to vector<8x16x128xf32>
    %c0_4 = arith.constant 0 : index
    %c0_5 = arith.constant 0 : index
    %6 = vector.load %arg4[%c0_4, %c0_5] : memref<16x128xf32, #tpu.memory_space<vmem>>, vector<16x128xf32>
    %7 = vector.shape_cast %6 : vector<16x128xf32> to vector<1x16x128xf32>
    %8 = vector.broadcast %7 : vector<1x16x128xf32> to vector<8x16x128xf32>
    %9 = arith.mulf %5, %8 : vector<8x16x128xf32>
    %10 = vector.shape_cast %9 : vector<8x16x128xf32> to vector<128x128xf32>
    %c0_6 = arith.constant 0 : index
    %c0_7 = arith.constant 0 : index
    %11 = vector.load %arg3[%c0_6, %c0_7] : memref<128x128xf32, #tpu.memory_space<vmem>>, vector<128x128xf32>
    %cst_8 = arith.constant dense<0.000000e+00> : vector<128x128xf32>
    %12 = tpu.matmul %10, %11, %cst_8 {dimension_numbers = #tpu.dot_dimension_numbers<[1], [0], [0], [1], [0, 0, 1, 1], [], []>} : vector<128x128xf32>, vector<128x128xf32>, vector<128x128xf32> -> vector<128x128xf32>
    %cst_9 = arith.constant 0.000000e+00 : f32
    %13 = vector.broadcast %cst_9 : f32 to vector<128x128xf32>
    %14 = arith.maximumf %12, %13 : vector<128x128xf32>
    %15 = vector.shape_cast %14 : vector<128x128xf32> to vector<8x16x128xf32>
    %cst_10 = arith.constant dense<0.000000e+00> : vector<8x128xf32>
    %16 = vector.multi_reduction <add>, %15, %cst_10 [1] : vector<8x16x128xf32> to vector<8x128xf32>
    %cst_11 = arith.constant 6.250000e-02 : f32
    %17 = vector.broadcast %cst_11 : f32 to vector<8x128xf32>
    %18 = arith.mulf %16, %17 : vector<8x128xf32>
    %c0_12 = arith.constant 0 : index
    %c0_13 = arith.constant 0 : index
    %19 = vector.load %arg5[%c0_12, %c0_13] : memref<8x128xf32, #tpu.memory_space<vmem>>, vector<8x128xf32>
    tpu.vector_store %arg5[%c0_12, %c0_13], %18 {strides = array<i32>} : memref<8x128xf32, #tpu.memory_space<vmem>>, vector<8x128xf32>,
    return
  }
  func.func @transform_0(%arg0: i32) -> (i32, i32) {
    %c0_i32 = arith.constant 0 : i32
    %c0_i32_0 = arith.constant 0 : i32
    return %arg0, %c0_i32 : i32, i32
  }
  func.func @transform_1(%arg0: i32) -> (i32, i32) {
    %c0_i32 = arith.constant 0 : i32
    %c0_i32_0 = arith.constant 0 : i32
    %c0_i32_1 = arith.constant 0 : i32
    return %c0_i32, %c0_i32_0 : i32, i32
  }
  func.func @transform_2(%arg0: i32) -> (i32, i32) {
    %c0_i32 = arith.constant 0 : i32
    %c0_i32_0 = arith.constant 0 : i32
    %c0_i32_1 = arith.constant 0 : i32
    return %c0_i32, %c0_i32_0 : i32, i32
  }
  func.func @transform_3(%arg0: i32) -> (i32, i32) {
    %c0_i32 = arith.constant 0 : i32
    %c0_i32_0 = arith.constant 0 : i32
    %c0_i32_1 = arith.constant 0 : i32
    return %c0_i32, %c0_i32_0 : i32, i32
  }
  func.func @transform_4(%arg0: i32) -> (i32, i32) {
    %c0_i32 = arith.constant 0 : i32
    %c0_i32_0 = arith.constant 0 : i32
    return %arg0, %c0_i32 : i32, i32
  }
}

</mosaic_0001>

<bundles_post_ra>
// kernel: tpu_custom_call.1
= control target key start
LH: loop header
LB: loop body
LE: loop exit
PB: predicated region body
PF: predicated region fallthrough
CT: control target
= control target key end

     0   :  { %9 = vsyncpa [#allocation3], 0  ;;  %s934_s0 = inlined_call_operand.vmem [shape: f32[128,8], index: 0, kind: input, shape index: {}]   ;;  %s935_s1 = inlined_call_operand.vmem [shape: f32[8,128], index: 1, kind: input, shape index: {}]   ;;  %s936_s2 = inlined_call_operand.vmem [shape: f32[128,128], index: 2, kind: input, shape index: {}]   ;;  %s937_s3 = inlined_call_operand.hbm [shape: f32[16,128], index: 3, kind: input, shape index: {}]   ;;  %s938_s4 = inlined_call_operand.hbm [shape: f32[8,128], index: 4, kind: output, shape index: {}]  }
   0x1   :  { %10 = vsyncpa [#allocation4], 0  ;;  %s784_s15 = smov [#allocation2]  }
   0x2   :  { %s22_s16 = sshll.u32 %s784_s15, 4  ;;  %s23_s16 = int_to_ptr.vmem [resolvable:$true] %s22_s16 }
   0x3   :  { %s748_s17 = scalar_lea.vmem %s23_s16, 256  ;;  %p753_p1 = scmp.lt.s32.totalorder %s23_s16, %s23_s16 }
   0x4   :  { %p749_p0 = scmp.ne.s32.totalorder %s23_s16, %s748_s17  ;;  %p754_p2 = scmp.lt.s32.totalorder %s748_s17, %s748_s17 }
   0x6   :  { %p755_p3 = por %p754_p2, %p753_p1 }
   0x8   :  { %p756_p4 = pnand %p755_p3, %p749_p0 }
   0xa   :  { %759 = shalt.err (!%p756_p4)
}
   0xb   :  { %s785_s18 = smov 128   ;;  %s786_s19 = smov 8  }
   0xc   :  { %28 = dma.hbm_to_vmem [thread:$0]  %s937_s3, 256, %s23_s16, [#allocation3], %s785_s18, %s785_s18, %s786_s19  }
   0xd   :  { %780 = dma.done.wait [#allocation3], 256  }
   0xe   :  { %781 = vsyncadd [#allocation3], 4294967040  ;;  %vm49_vm0 = vcmask 64512   ;;  %v48_v0 = vld [vmem:[%s935_s1] sm:$0xff]  ;;  %v33_v2 = vld [vmem:[%s934_s0 + $0x8] sm:$0xff]  ;;  %vm526_vm1 = vcmask 1041409  }
   0xf   :  { %v32_v1 = vld [vmem:[%s934_s0] sm:$0xff]  ;;  %622 = vmatprep.subr.mxu0 %v48_v0  ;;  %v34_v3 = vld [vmem:[%s934_s0 + $0x10] sm:$0xff]  ;;  %v35_v4 = vld [vmem:[%s934_s0 + $0x18] sm:$0xff]  ;;  %vm528_vm2 = vcmask 1042434   ;;  %vm530_vm3 = vcmask 1043459   ;;  %vm532_vm4 = vcmask 1044484  }
  0x10   :  { %624 = vmatprep.mubr.msk.f32.mxu0 %vm49_vm0, %v32_v1  ;;  %623 = vmatpush3.msra.mxu0 %v48_v0  ;;  %v36_v5 = vld [vmem:[%s934_s0 + $0x20] sm:$0xff]  ;;  %v292_v6 = vld [vmem:[%s936_s2 + $0x78] sm:$0xff]  ;;  %v291_v7 = vld [vmem:[%s936_s2 + $0x70] sm:$0xff]  ;;  %vm534_vm5 = vcmask 1045509   ;;  %vm536_vm6 = vcmask 1046534   ;;  %vm538_vm7 = vcmask 1047559  }
  0x11   :  { %625 = vmatmul.mubr.msk.f32.vlgmr.msra.gmra.mxu0 %vm49_vm0, %v33_v2  ;;  %648 = vmatprep.subr.mxu0 %v292_v6  ;;  %v37_v8 = vld [vmem:[%s934_s0 + $0x28] sm:$0xff]  ;;  %v38_v10 = vld [vmem:[%s934_s0 + $0x30] sm:$0xff]  ;;  %v289_v11 = vld [vmem:[%s936_s2 + $0x60] sm:$0xff] }
  0x12   :  { %627 = vmatprep.mubr.msk.f32.mxu0 %vm49_vm0, %v34_v3  ;;  %704 = vmatprep.subr.mxu1 %v292_v6  ;;  %v290_v9 = vld [vmem:[%s936_s2 + $0x68] sm:$0xff]  ;;  %v39_v12 = vld [vmem:[%s934_s0 + $0x38] sm:$0xff]  ;;  %v40_v14 = vld [vmem:[%s934_s0 + $0x40] sm:$0xff] }
  0x13   :  { %720 = vmatpush3.msra.mxu1 %v292_v6  ;;  %649 = vmatpush3.msra.mxu0 %v292_v6  ;;  %v288_v13 = vld [vmem:[%s936_s2 + $0x58] sm:$0xff]  ;;  %v287_v15 = vld [vmem:[%s936_s2 + $0x50] sm:$0xff]  ;;  %v41_v16 = vld [vmem:[%s934_s0 + $0x48] sm:$0xff] }
  0x14   :  { %650 = vmatprep.subr.mxu0 %v291_v7  ;;  %705 = vmatprep.subr.mxu1 %v291_v7  ;;  %v286_v17 = vld [vmem:[%s936_s2 + $0x48] sm:$0xff]  ;;  %v42_v18 = vld [vmem:[%s934_s0 + $0x50] sm:$0xff]  ;;  %v285_v19 = vld [vmem:[%s936_s2 + $0x40] sm:$0xff] }
  0x15   :  { %628 = vmatmul.mubr.msk.f32.gmra.mxu0 %vm49_vm0, %v35_v4  ;;  %721 = vmatpush3.msra.mxu1 %v291_v7  ;;  %v43_v20 = vld [vmem:[%s934_s0 + $0x58] sm:$0xff]  ;;  %v44_v22 = vld [vmem:[%s934_s0 + $0x60] sm:$0xff]  ;;  %v283_v23 = vld [vmem:[%s936_s2 + $0x30] sm:$0xff] }
  0x16   :  { %630 = vmatprep.mubr.msk.f32.mxu0 %vm49_vm0, %v36_v5  ;;  %651 = vmatpush3.msra.mxu0 %v291_v7  ;;  %v284_v21 = vld [vmem:[%s936_s2 + $0x38] sm:$0xff]  ;;  %v45_v24 = vld [vmem:[%s934_s0 + $0x68] sm:$0xff]  ;;  %v46_v26 = vld [vmem:[%s934_s0 + $0x70] sm:$0xff] }
  0x17   :  { %652 = vmatprep.subr.mxu0 %v290_v9  ;;  %706 = vmatprep.subr.mxu1 %v290_v9  ;;  %v282_v25 = vld [vmem:[%s936_s2 + $0x28] sm:$0xff]  ;;  %v281_v27 = vld [vmem:[%s936_s2 + $0x20] sm:$0xff]  ;;  %v47_v28 = vld [vmem:[%s934_s0 + $0x78] sm:$0xff] }
  0x18   :  { %653 = vmatpush3.msra.mxu0 %v290_v9  ;;  %722 = vmatpush3.msra.mxu1 %v290_v9  ;;  %v280_v29 = vld [vmem:[%s936_s2 + $0x18] sm:$0xff]  ;;  %v279_v30 = vld [vmem:[%s936_s2 + $0x10] sm:$0xff]  ;;  %v278_v31 = vld [vmem:[%s936_s2 + $0x8] sm:$0xff] }
  0x19   :  { %631 = vmatmul.mubr.msk.f32.gmra.mxu0 %vm49_vm0, %v37_v8  ;;  %654 = vmatprep.subr.mxu0 %v289_v11  ;;  %v277_v32 = vld [vmem:[%s936_s2] sm:$0xff]  ;;  %v260_v37 = vld [vmem:[#allocation2 + $0x8] sm:$0xff]  ;;  %s787_s2 = smov [#allocation5]  }
  0x1a   :  { %633 = vmatprep.mubr.msk.f32.mxu0 %vm49_vm0, %v38_v10  ;;  %655 = vmatpush3.msra.mxu0 %v289_v11  ;;  %v259_v36 = vld [vmem:[#allocation2] sm:$0xff]  ;;  %s548_s29 = sshll.u32 %s787_s2, 4  ;;  %s549_s29 = int_to_ptr.vmem [resolvable:$true] %s548_s29 }
  0x1b   :  { %656 = vmatprep.subr.mxu0 %v288_v13  ;;  %707 = vmatprep.subr.mxu1 %v289_v11  ;;  %s760_s30 = scalar_lea.vmem %s549_s29, 128  ;;  %p765_p6 = scmp.lt.s32.totalorder %s549_s29, %s549_s29 }
  0x1c   :  { %657 = vmatpush3.msra.mxu0 %v288_v13  ;;  %723 = vmatpush3.msra.mxu1 %v289_v11  ;;  %p761_p5 = scmp.ne.s32.totalorder %s549_s29, %s760_s30  ;;  %p766_p7 = scmp.lt.s32.totalorder %s760_s30, %s760_s30 }
  0x1d   :  { %634 = vmatmul.mubr.msk.f32.gmra.mxu0 %vm49_vm0, %v39_v12  ;;  %658 = vmatprep.subr.mxu0 %v287_v15 }
  0x1e   :  { %636 = vmatprep.mubr.msk.f32.mxu0 %vm49_vm0, %v40_v14  ;;  %659 = vmatpush3.msra.mxu0 %v287_v15  ;;  %p767_p8 = por %p766_p7, %p765_p6 }
  0x1f   :  { %660 = vmatprep.subr.mxu0 %v286_v17  ;;  %708 = vmatprep.subr.mxu1 %v288_v13 }
  0x20   :  { %661 = vmatpush3.msra.mxu0 %v286_v17  ;;  %724 = vmatpush3.msra.mxu1 %v288_v13  ;;  %p768_p9 = pnand %p767_p8, %p761_p5 }
  0x21   :  { %637 = vmatmul.mubr.msk.f32.gmra.mxu0 %vm49_vm0, %v41_v16  ;;  %662 = vmatprep.subr.mxu0 %v285_v19 }
  0x22   :  { %639 = vmatprep.mubr.msk.f32.mxu0 %vm49_vm0, %v42_v18  ;;  %663 = vmatpush3.msra.mxu0 %v285_v19 }
  0x23   :  { %664 = vmatprep.subr.mxu0 %v284_v21  ;;  %709 = vmatprep.subr.mxu1 %v287_v15 }
  0x24   :  { %665 = vmatpush3.msra.mxu0 %v284_v21  ;;  %725 = vmatpush3.msra.mxu1 %v287_v15 }
  0x25   :  { %640 = vmatmul.mubr.msk.f32.gmra.mxu0 %vm49_vm0, %v43_v20  ;;  %666 = vmatprep.subr.mxu0 %v283_v23 }
  0x26   :  { %642 = vmatprep.mubr.msk.f32.mxu0 %vm49_vm0, %v44_v22  ;;  %667 = vmatpush3.msra.mxu0 %v283_v23 }
  0x27   :  { %668 = vmatprep.subr.mxu0 %v282_v25  ;;  %710 = vmatprep.subr.mxu1 %v286_v17 }
  0x28   :  { %669 = vmatpush3.msra.mxu0 %v282_v25  ;;  %726 = vmatpush3.msra.mxu1 %v286_v17 }
  0x29   :  { %643 = vmatmul.mubr.msk.f32.gmra.mxu0 %vm49_vm0, %v45_v24  ;;  %670 = vmatprep.subr.mxu0 %v281_v27 }
  0x2a   :  { %645 = vmatprep.mubr.msk.f32.mxu0 %vm49_vm0, %v46_v26  ;;  %671 = vmatpush3.msra.mxu0 %v281_v27 }
  0x2b   :  { %711 = vmatprep.subr.mxu1 %v285_v19  ;;  %672 = vmatprep.subr.mxu0 %v280_v29 }
  0x2c   :  { %727 = vmatpush3.msra.mxu1 %v285_v19  ;;  %673 = vmatpush3.msra.mxu0 %v280_v29 }
  0x2d   :  { %646 = vmatmul.mubr.msk.f32.gmra.mxu0 %vm49_vm0, %v47_v28  ;;  %712 = vmatprep.subr.mxu1 %v284_v21 }
  0x2e   :  { %728 = vmatpush3.msra.mxu1 %v284_v21  ;;  %674 = vmatprep.subr.mxu0 %v279_v30 }
  0x2f   :  { %713 = vmatprep.subr.mxu1 %v283_v23  ;;  %675 = vmatpush3.msra.mxu0 %v279_v30 }
  0x30   :  { %729 = vmatpush3.msra.mxu1 %v283_v23  ;;  %676 = vmatprep.subr.mxu0 %v278_v31 }
  0x31   :  { %714 = vmatprep.subr.mxu1 %v282_v25  ;;  %677 = vmatpush3.msra.mxu0 %v278_v31 }
  0x32   :  { %730 = vmatpush3.msra.mxu1 %v282_v25  ;;  %678 = vmatprep.subr.mxu0 %v277_v32 }
  0x33   :  { %715 = vmatprep.subr.mxu1 %v281_v27  ;;  %679 = vmatpush3.msra.mxu0 %v277_v32 }
  0x34   :  { %731 = vmatpush3.msra.mxu1 %v281_v27 }
  0x35   :  { %716 = vmatprep.subr.mxu1 %v280_v29 }
  0x36   :  { %732 = vmatpush3.msra.mxu1 %v280_v29 }
  0x37   :  { %717 = vmatprep.subr.mxu1 %v279_v30 }
  0x38   :  { %733 = vmatpush3.msra.mxu1 %v279_v30 }
  0x39   :  { %718 = vmatprep.subr.mxu1 %v278_v31 }
  0x3a   :  { %734 = vmatpush3.msra.mxu1 %v278_v31 }
  0x3b   :  { %719 = vmatprep.subr.mxu1 %v277_v32 }
  0x3c   :  { %735 = vmatpush3.msra.mxu1 %v277_v32 }
  0xd1   :  { %v626_v33 = vpop.f32.mrf.mxu0 }
  0xd2   :  { %v244_v34 = vmax.f32 %v626_v33, 0.0 }
  0xd3   :  { %v164_v35 = vpop.f32.mrf.mxu0 }
  0xd4   :  { %v243_v38 = vmax.f32 %v164_v35, 0.0  ;;  %v262_v41 = vmul.f32 %v260_v37, %v244_v34 }
  0xd5   :  { %v629_v39 = vpop.f32.mrf.mxu0 }
  0xd6   :  { %v261_v40 = vmul.f32 %v259_v36, %v243_v38  ;;  %v246_v42 = vmax.f32 %v629_v39, 0.0 }
  0xd7   :  { %v174_v43 = vpop.f32.mrf.mxu0 }
  0xd8   :  { %v245_v44 = vmax.f32 %v174_v43, 0.0  ;;  %680 = vmatprep.mubr.f32.mxu0 %v261_v40  ;;  %v264_v47 = vmul.f32 %v260_v37, %v246_v42 }
  0xd9   :  { %v632_v45 = vpop.f32.mrf.mxu0  ;;  %681 = vmatmul.mubr.f32.vlgmr.msra.gmra.mxu0 %v262_v41 }
  0xda   :  { %v263_v46 = vmul.f32 %v259_v36, %v245_v44  ;;  %v248_v48 = vmax.f32 %v632_v45, 0.0 }
  0xdb   :  { %v184_v49 = vpop.f32.mrf.mxu0 }
  0xdc   :  { %v247_v50 = vmax.f32 %v184_v49, 0.0  ;;  %683 = vmatprep.mubr.f32.mxu0 %v263_v46  ;;  %v266_v53 = vmul.f32 %v260_v37, %v248_v48 }
  0xdd   :  { %v635_v51 = vpop.f32.mrf.mxu0  ;;  %684 = vmatmul.mubr.f32.gmra.mxu0 %v264_v47 }
  0xde   :  { %v265_v52 = vmul.f32 %v259_v36, %v247_v50  ;;  %v250_v54 = vmax.f32 %v635_v51, 0.0 }
  0xdf   :  { %v194_v55 = vpop.f32.mrf.mxu0 }
  0xe0   :  { %v249_v56 = vmax.f32 %v194_v55, 0.0  ;;  %686 = vmatprep.mubr.f32.mxu0 %v265_v52  ;;  %v268_v59 = vmul.f32 %v260_v37, %v250_v54 }
  0xe1   :  { %v638_v57 = vpop.f32.mrf.mxu0  ;;  %687 = vmatmul.mubr.f32.gmra.mxu0 %v266_v53 }
  0xe2   :  { %v267_v58 = vmul.f32 %v259_v36, %v249_v56  ;;  %v252_v60 = vmax.f32 %v638_v57, 0.0 }
  0xe3   :  { %v204_v61 = vpop.f32.mrf.mxu0 }
  0xe4   :  { %v251_v62 = vmax.f32 %v204_v61, 0.0  ;;  %689 = vmatprep.mubr.f32.mxu1 %v267_v58  ;;  %v270_v1 = vmul.f32 %v260_v37, %v252_v60 }
  0xe5   :  { %v641_v63 = vpop.f32.mrf.mxu0  ;;  %690 = vmatmul.mubr.f32.vlgmr.msra.gmra.mxu1 %v268_v59 }
  0xe6   :  { %v269_v0 = vmul.f32 %v259_v36, %v251_v62  ;;  %v254_v2 = vmax.f32 %v641_v63, 0.0 }
  0xe7   :  { %v214_v3 = vpop.f32.mrf.mxu0 }
  0xe8   :  { %v253_v4 = vmax.f32 %v214_v3, 0.0  ;;  %692 = vmatprep.mubr.f32.mxu1 %v269_v0  ;;  %v272_v7 = vmul.f32 %v260_v37, %v254_v2 }
  0xe9   :  { %v644_v5 = vpop.f32.mrf.mxu0  ;;  %693 = vmatmul.mubr.f32.gmra.mxu1 %v270_v1 }
  0xea   :  { %v271_v6 = vmul.f32 %v259_v36, %v253_v4  ;;  %v256_v8 = vmax.f32 %v644_v5, 0.0 }
  0xeb   :  { %v224_v9 = vpop.f32.mrf.mxu0 }
  0xec   :  { %v255_v10 = vmax.f32 %v224_v9, 0.0  ;;  %695 = vmatprep.mubr.f32.mxu1 %v271_v6  ;;  %v274_v13 = vmul.f32 %v260_v37, %v256_v8 }
  0xed   :  { %v647_v11 = vpop.f32.mrf.mxu0  ;;  %696 = vmatmul.mubr.f32.gmra.mxu1 %v272_v7 }
  0xee   :  { %v273_v12 = vmul.f32 %v259_v36, %v255_v10  ;;  %v258_v14 = vmax.f32 %v647_v11, 0.0 }
  0xef   :  { %v234_v15 = vpop.f32.mrf.mxu0 }
  0xf0   :  { %v257_v16 = vmax.f32 %v234_v15, 0.0  ;;  %698 = vmatprep.mubr.f32.mxu1 %v273_v12  ;;  %v276_v18 = vmul.f32 %v260_v37, %v258_v14 }
  0xf1   :  { %699 = vmatmul.mubr.f32.gmra.mxu1 %v274_v13 }
  0xf2   :  { %v275_v17 = vmul.f32 %v259_v36, %v257_v16 }
  0xf4   :  { %701 = vmatprep.mubr.f32.mxu1 %v275_v17 }
  0xf5   :  { %702 = vmatmul.mubr.f32.gmra.mxu1 %v276_v18 }
 0x199   :  { %v682_v19 = vpop.f32.mrf.mxu0 }
 0x19a   :  { %v439_v27 = vmax.f32 %v682_v19, 0.0 }
 0x19b   :  { %v359_v20 = vpop.f32.mrf.mxu0 }
 0x19c   :  { %v438_v24 = vmax.f32 %v359_v20, 0.0 }
 0x19d   :  { %v685_v21 = vpop.f32.mrf.mxu0 }
 0x19e   :  { %v441_v25 = vmax.f32 %v685_v21, 0.0  ;;  %v454_v32 = vadd.f32 %v439_v27, %v438_v24 }
 0x19f   :  { %v369_v22 = vpop.f32.mrf.mxu0 }
 0x1a0   :  { %v440_v23 = vmax.f32 %v369_v22, 0.0  ;;  %v455_v39 = vrot.slane %v454_v32, 4 }
 0x1a1   :  { %v688_v26 = vpop.f32.mrf.mxu0 }
 0x1a2   :  { %v461_v28 = vadd.f32 %v441_v25, %v440_v23  ;;  %v443_v30 = vmax.f32 %v688_v26, 0.0  ;;  %v456_v46 = vadd.f32 %v455_v39, %v454_v32 }
 0x1a3   :  { %v379_v29 = vpop.f32.mrf.mxu0 }
 0x1a4   :  { %v442_v31 = vmax.f32 %v379_v29, 0.0  ;;  %v462_v35 = vrot.slane %v461_v28, 4  ;;  %v457_v57 = vrot.slane %v456_v46, 2 }
 0x1a5   :  { %v691_v33 = vpop.f32.mrf.mxu1 }
 0x1a6   :  { %v468_v34 = vadd.f32 %v443_v30, %v442_v31  ;;  %v445_v37 = vmax.f32 %v691_v33, 0.0  ;;  %v463_v43 = vadd.f32 %v462_v35, %v461_v28  ;;  %v458_v5 = vadd.f32 %v457_v57, %v456_v46 }
 0x1a7   :  { %v389_v36 = vpop.f32.mrf.mxu1 }
 0x1a8   :  { %v444_v38 = vmax.f32 %v389_v36, 0.0  ;;  %v469_v40 = vrot.slane %v468_v34, 4  ;;  %v464_v52 = vrot.slane %v463_v43, 2  ;;  %v459_v19 = vrot.slane %v458_v5, 1 }
 0x1a9   :  { %v694_v41 = vpop.f32.mrf.mxu1 }
 0x1aa   :  { %v475_v42 = vadd.f32 %v445_v37, %v444_v38  ;;  %v470_v47 = vadd.f32 %v469_v40, %v468_v34  ;;  %v447_v48 = vmax.f32 %v694_v41, 0.0  ;;  %v465_v63 = vadd.f32 %v464_v52, %v463_v43 }
 0x1ab   :  { %v399_v44 = vpop.f32.mrf.mxu1  ;;  %v460_v31 = vadd.f32 %v459_v19, %v458_v5 }
 0x1ac   :  { %v476_v45 = vrot.slane %v475_v42, 4  ;;  %v446_v49 = vmax.f32 %v399_v44, 0.0  ;;  %v471_v58 = vrot.slane %v470_v47, 2  ;;  %v466_v12 = vrot.slane %v465_v63, 1 }
 0x1ad   :  { %v697_v50 = vpop.f32.mrf.mxu1  ;;  %v510_v41 = vmul.f32 0.0625, %v460_v31 }
 0x1ae   :  { %v477_v51 = vadd.f32 %v476_v45, %v475_v42  ;;  %v482_v53 = vadd.f32 %v447_v48, %v446_v49  ;;  %v449_v55 = vmax.f32 %v697_v50, 0.0  ;;  %v472_v6 = vadd.f32 %v471_v58, %v470_v47 }
 0x1af   :  { %v409_v54 = vpop.f32.mrf.mxu1  ;;  %v467_v26 = vadd.f32 %v466_v12, %v465_v63 }
 0x1b0   :  { %v448_v56 = vmax.f32 %v409_v54, 0.0  ;;  %v483_v59 = vrot.slane %v482_v53, 4  ;;  %v478_v61 = vrot.slane %v477_v51, 2  ;;  %v473_v20 = vrot.slane %v472_v6, 1 }
 0x1b1   :  { %v700_v60 = vpop.f32.mrf.mxu1  ;;  %v511_v36 = vmul.f32 0.0625, %v467_v26 }
 0x1b2   :  { %v489_v62 = vadd.f32 %v449_v55, %v448_v56  ;;  %v484_v0 = vadd.f32 %v483_v59, %v482_v53  ;;  %v451_v3 = vmax.f32 %v700_v60, 0.0  ;;  %v479_v9 = vadd.f32 %v478_v61, %v477_v51 }
 0x1b3   :  { %v419_v1 = vpop.f32.mrf.mxu1  ;;  %v474_v30 = vadd.f32 %v473_v20, %v472_v6  ;;  %v527_v46 = vsel %vm526_vm1, %v511_v36, %v510_v41 }
 0x1b4   :  { %v490_v2 = vrot.slane %v489_v62, 4  ;;  %v450_v4 = vmax.f32 %v419_v1, 0.0  ;;  %v485_v7 = vrot.slane %v484_v0, 2  ;;  %v480_v21 = vrot.slane %v479_v9, 1 }
 0x1b5   :  { %v703_v8 = vpop.f32.mrf.mxu1  ;;  %v512_v40 = vmul.f32 0.0625, %v474_v30 }
 0x1b6   :  { %v491_v10 = vadd.f32 %v490_v2, %v489_v62  ;;  %v496_v11 = vadd.f32 %v451_v3, %v450_v4  ;;  %v486_v13 = vadd.f32 %v485_v7, %v484_v0  ;;  %v453_v17 = vmax.f32 %v703_v8, 0.0 }
 0x1b7   :  { %v429_v14 = vpop.f32.mrf.mxu1  ;;  %v481_v32 = vadd.f32 %v480_v21, %v479_v9  ;;  %v529_v49 = vsel %vm528_vm2, %v512_v40, %v527_v46 }
 0x1b8   :  { %v492_v15 = vrot.slane %v491_v10, 2  ;;  %v497_v16 = vrot.slane %v496_v11, 4  ;;  %v452_v18 = vmax.f32 %v429_v14, 0.0  ;;  %v487_v25 = vrot.slane %v486_v13, 1 }
 0x1b9   :  { %v513_v42 = vmul.f32 0.0625, %v481_v32 }
 0x1ba   :  { %v493_v22 = vadd.f32 %v492_v15, %v491_v10  ;;  %v498_v23 = vadd.f32 %v497_v16, %v496_v11  ;;  %v503_v24 = vadd.f32 %v453_v17, %v452_v18  ;;  %v488_v35 = vadd.f32 %v487_v25, %v486_v13 }
 0x1bb   :  { %v531_v52 = vsel %vm530_vm3, %v513_v42, %v529_v49 }
 0x1bc   :  { %v494_v27 = vrot.slane %v493_v22, 1  ;;  %v499_v28 = vrot.slane %v498_v23, 2  ;;  %v504_v29 = vrot.slane %v503_v24, 4  ;;  %v514_v45 = vmul.f32 0.0625, %v488_v35 }
 0x1be   :  { %v500_v33 = vadd.f32 %v499_v28, %v498_v23  ;;  %v505_v34 = vadd.f32 %v504_v29, %v503_v24  ;;  %v495_v37 = vadd.f32 %v494_v27, %v493_v22  ;;  %v533_v53 = vsel %vm532_vm4, %v514_v45, %v531_v52 }
 0x1c0   :  { %v501_v38 = vrot.slane %v500_v33, 1  ;;  %v506_v39 = vrot.slane %v505_v34, 2  ;;  %v515_v47 = vmul.f32 0.0625, %v495_v37 }
 0x1c2   :  { %v502_v43 = vadd.f32 %v501_v38, %v500_v33  ;;  %v507_v44 = vadd.f32 %v506_v39, %v505_v34  ;;  %v535_v55 = vsel %vm534_vm5, %v515_v47, %v533_v53 }
 0x1c4   :  { %v508_v48 = vrot.slane %v507_v44, 1  ;;  %v516_v50 = vmul.f32 0.0625, %v502_v43 }
 0x1c6   :  { %v509_v51 = vadd.f32 %v508_v48, %v507_v44  ;;  %v537_v56 = vsel %vm536_vm6, %v516_v50, %v535_v55 }
 0x1c8   :  { %v517_v54 = vmul.f32 0.0625, %v509_v51 }
 0x1ca   :  { %v539_v57 = vsel %vm538_vm7, %v517_v54, %v537_v56 }
 0x1cb   :  { %541 = vst [vmem:[#allocation5] sm:$0xff] %v539_v57 }
 0x1cc   :  { %771 = shalt.err (!%p768_p9)
}
 0x1cd   :  { %551 = dma.vmem_to_hbm [thread:$0]  %s549_s29, 128, %s938_s4, [#allocation4]  }
 0x1ce   :  { %782 = dma.done.wait [#allocation4], 128  }
 0x1cf   :  { %783 = vsyncadd [#allocation4], 4294967168 }
 0x1d0   :  { %555 = vsyncpa [#allocation3], 1 }
 0x1d1   :  { %556 = vsyncpa [#allocation4], 1 }

</bundles_post_ra>
